<compile_context>
chip_gen: v5e
topology: v5e:2x2
jax: 0.10.0
libtpu: 0.0.40
codegen_flags: <defaults>
</compile_context>

<pallas_src>
import functools

import jax
import jax.numpy as jnp
from jax.experimental import pallas as pl
from jax.experimental.pallas import tpu as pltpu

LN_EPS = 1e-5  # PyTorch nn.LayerNorm default

# Row layout of the packed "vecs" array: 3 x (bias, ln_gamma, ln_beta),
# then the head weight (w4^T) and head bias (broadcast).
_ROW_L1, _ROW_L2, _ROW_L3 = 0, 3, 6
_ROW_W4, _ROW_B4 = 9, 10
_NUM_VEC_ROWS = 11

# Force >= 2 batch tiles (so the "parallel" axis can use both v7x TensorCores)
# once the padded batch reaches this many rows.
_SPLIT_MIN_ROWS = 256


def _round_up(x, m):
    return (x + m - 1) // m * m


def _default_bf16_affine():
    """Enable bf16 post-stats LayerNorm only where the VALU is bf16-capable."""
    try:
        kind = jax.devices()[0].device_kind.lower()
    except Exception:
        return False
    return ("v6" in kind) or ("v7" in kind)


def _vf_kernel(x_ref, w1_ref, w2_ref, w3_ref, vecs_ref, o_ref, *, bf16_affine):
    """Whole MLP forward for one batch tile, entirely in VMEM."""

    def lin_ln_relu(h, w_ref, r):
        # Linear on the MXU: bf16 x bf16 -> f32 accumulate.
        z = jnp.dot(h.astype(jnp.bfloat16), w_ref[...],
                    preferred_element_type=jnp.float32)
        z = z + vecs_ref[r:r + 1, :]
        # LayerNorm statistics in f32 (biased variance, like PyTorch).
        mu = jnp.mean(z, axis=-1, keepdims=True)
        d = z - mu
        var = jnp.mean(d * d, axis=-1, keepdims=True)
        dn = d * jax.lax.rsqrt(var + LN_EPS)
        if bf16_affine:
            # v6e / v7x: affine + ReLU in bf16 (halves VALU vreg traffic);
            # the result feeds the next bf16 matmul with no extra cast.
            dn = dn.astype(jnp.bfloat16)
            g = vecs_ref[r + 1:r + 2, :].astype(jnp.bfloat16)
            b = vecs_ref[r + 2:r + 3, :].astype(jnp.bfloat16)
        else:
            # v5e (no bf16 VALU): stay in f32.
            g = vecs_ref[r + 1:r + 2, :]
            b = vecs_ref[r + 2:r + 3, :]
        return jnp.maximum(dn * g + b, 0)  # ReLU

    h = x_ref[...]
    h = lin_ln_relu(h, w1_ref, _ROW_L1)
    h = lin_ln_relu(h, w2_ref, _ROW_L2)
    h = lin_ln_relu(h, w3_ref, _ROW_L3)

    # Head Linear(H, 1): elementwise multiply + lane reduction on VPU/XLU
    # (avoids an N=1 MXU push).  Output block is (TB, 1) -> 4 B/row writeback.
    w4 = vecs_ref[_ROW_W4:_ROW_W4 + 1, :]
    b4 = vecs_ref[_ROW_B4:_ROW_B4 + 1, 0:1]
    val = jnp.sum(h * w4, axis=-1, keepdims=True) + b4          # (TB, 1) f32
    o_ref[...] = val.astype(o_ref.dtype)


def prepare_params(params):
    """Pack params into the kernel layout: bf16 weight matrices + one (11, H)
    f32 array holding all biases / LayerNorm params / the head weight row."""
    H = params["w1"].shape[1]
    vecs = jnp.concatenate(
        [
            params["b1"], params["g1"], params["be1"],
            params["b2"], params["g2"], params["be2"],
            params["b3"], params["g3"], params["be3"],
            params["w4"].T,                               # row 9: head weight
            jnp.broadcast_to(params["b4"], (1, H)),       # row 10: head bias
        ],
        axis=0,
    ).astype(jnp.float32)
    return dict(
        w1=params["w1"].astype(jnp.bfloat16),
        w2=params["w2"].astype(jnp.bfloat16),
        w3=params["w3"].astype(jnp.bfloat16),
        vecs=vecs,
    )


def _choose_batch_tile(B, tb):
    """Batch tile (multiple of 8) and padded batch size (multiple of tile)."""
    B8 = _round_up(max(B, 1), 8)
    TB = min(_round_up(max(tb, 1), 8), B8)
    # Keep >= 2 tiles for mid/large batches so dimension_semantics="parallel"
    # can actually shard the grid across both v7x TensorCores.
    if TB >= B8 and B8 >= _SPLIT_MIN_ROWS:
        TB = _round_up(pl.cdiv(B8, 2), 8)
    return TB, _round_up(B, TB)


@functools.partial(jax.jit, static_argnames=("tb", "bf16_affine"))
def value_function_forward(state, packed, tb=1024, bf16_affine=None):
    """state: (B, state_dim) f32, packed: prepare_params output -> (B, 1) f32."""
    if bf16_affine is None:
        bf16_affine = _default_bf16_affine()

    B, S = state.shape
    H = packed["w1"].shape[1]

    TB, B_pad = _choose_batch_tile(B, tb)
    if B_pad != B:
        state = jnp.pad(state, ((0, B_pad - B), (0, 0)))

    grid = (B_pad // TB,)

    # Constant-index-map blocks: single-buffered, stay VMEM-resident.
    resident = dict(pipeline_mode=pl.Buffered(1))
    in_specs = [
        pl.BlockSpec((TB, S), lambda i: (i, 0)),              # activations: tiled
        pl.BlockSpec((S, H), lambda i: (0, 0), **resident),   # weights: resident
        pl.BlockSpec((H, H), lambda i: (0, 0), **resident),
        pl.BlockSpec((H, H), lambda i: (0, 0), **resident),
        pl.BlockSpec((_NUM_VEC_ROWS, H), lambda i: (0, 0), **resident),
    ]
    out_specs = pl.BlockSpec((TB, 1), lambda i: (i, 0))

    out = pl.pallas_call(
        functools.partial(_vf_kernel, bf16_affine=bf16_affine),
        out_shape=jax.ShapeDtypeStruct((B_pad, 1), jnp.float32),
        grid_spec=pltpu.PrefetchScalarGridSpec(
            num_scalar_prefetch=0,
            grid=grid,
            in_specs=in_specs,
            out_specs=out_specs,
        ),
        compiler_params=pltpu.CompilerParams(
            # Batch tiles are independent -> shard across TCs on v7x.
            dimension_semantics=("parallel",),
            # H=256 weights (~0.27 MiB bf16) + a few MiB of LN temporaries at
            # TB=1024 are far under the default scoped VMEM limit; K-tile the
            # (H, H) layers only if H is scaled to >= 2048.
        ),
    )(state, packed["w1"], packed["w2"], packed["w3"], packed["vecs"])

    return out[:B]


def init_params(key, state_dim, hidden_dim):
    """Deterministic synthetic init (Kaiming-uniform-ish for linears,
    ones/zeros for LayerNorm, mirroring PyTorch defaults)."""
    ks = jax.random.split(key, 8)

    def linear(kw, kb, fan_in, fan_out):
        bound = 1.0 / jnp.sqrt(fan_in)
        w = jax.random.uniform(kw, (fan_in, fan_out), jnp.float32, -bound, bound)
        b = jax.random.uniform(kb, (1, fan_out), jnp.float32, -bound, bound)
        return w, b

    w1, b1 = linear(ks[0], ks[1], state_dim, hidden_dim)
    w2, b2 = linear(ks[2], ks[3], hidden_dim, hidden_dim)
    w3, b3 = linear(ks[4], ks[5], hidden_dim, hidden_dim)
    w4, b4 = linear(ks[6], ks[7], hidden_dim, 1)

    ones = jnp.ones((1, hidden_dim), jnp.float32)
    zeros = jnp.zeros((1, hidden_dim), jnp.float32)

    return dict(
        w1=w1, b1=b1, g1=ones, be1=zeros,
        w2=w2, b2=b2, g2=ones, be2=zeros,
        w3=w3, b3=b3, g3=ones, be3=zeros,
        w4=w4, b4=b4,
    )


def _reference_forward(state, p):
    """Pure f32 reference matching the PyTorch module semantics."""
    def blk(h, w, b, g, be):
        z = h @ w + b
        mu = jnp.mean(z, axis=-1, keepdims=True)
        var = jnp.mean((z - mu) ** 2, axis=-1, keepdims=True)
        zn = (z - mu) * jax.lax.rsqrt(var + LN_EPS) * g + be
        return jnp.maximum(zn, 0.0)

    h = blk(state, p["w1"], p["b1"], p["g1"], p["be1"])
    h = blk(h, p["w2"], p["b2"], p["g2"], p["be2"])
    h = blk(h, p["w3"], p["b3"], p["g3"], p["be3"])
    return h @ p["w4"] + p["b4"]


if __name__ == "__main__":
    state_dim = 32
    hidden_dim = 256

    key = jax.random.PRNGKey(0)
    k_params, k_s1, k_s2, k_s3 = jax.random.split(key, 4)

    params = init_params(k_params, state_dim, hidden_dim)
    packed = prepare_params(params)

    # Test 1: small batch, single tile.
    state1 = jax.random.normal(k_s1, (8, state_dim), jnp.float32)
    out1 = jax.block_until_ready(value_function_forward(state1, packed))
    ref1 = _reference_forward(state1, params)
    assert out1.shape == (8, 1)
    # bf16 matmul path -> loosened tolerance vs. the f32 reference.
    assert jnp.allclose(out1, ref1, atol=5e-2, rtol=5e-2)

    # Test 2: ragged batch + small non-default tile -> padding + multi-tile grid.
    state2 = jax.random.normal(k_s2, (37, state_dim), jnp.float32)
    out2 = jax.block_until_ready(value_function_forward(state2, packed, tb=16))
    ref2 = _reference_forward(state2, params)
    assert out2.shape == (37, 1)
    assert jnp.allclose(out2, ref2, atol=5e-2, rtol=5e-2)

    # Test 3: mid-size batch -> default tile is capped at ~B/2 so the grid has
    # >= 2 "parallel" tiles (v7x dual-TensorCore path).
    state3 = jax.random.normal(k_s3, (300, state_dim), jnp.float32)
    out3 = jax.block_until_ready(value_function_forward(state3, packed))
    ref3 = _reference_forward(state3, params)
    assert out3.shape == (300, 1)
    assert jnp.allclose(out3, ref3, atol=5e-2, rtol=5e-2)

    print("KERNEL_OK")
</pallas_src>

<mosaic_0001>
module attributes {stable_mosaic.version = 11 : i64} {
  func.func @_vf_kernel(%arg0: i32, %arg1: memref<8x32xf32, #tpu.memory_space<vmem>>, %arg2: memref<32x256xbf16, #tpu.memory_space<vmem>>, %arg3: memref<256x256xbf16, #tpu.memory_space<vmem>>, %arg4: memref<256x256xbf16, #tpu.memory_space<vmem>>, %arg5: memref<11x256xf32, #tpu.memory_space<vmem>>, %arg6: memref<8x1xf32, #tpu.memory_space<vmem>>) attributes {dimension_semantics = [#tpu.dimension_semantics<parallel>], iteration_bounds = array<i64: 1>, scalar_prefetch = 0 : i64, scratch_operands = 0 : i64, tpu.core_type = #tpu.core_type<tc>, window_params = [{transform_indices = @transform_0, window_bounds = array<i64: 8, 32>}, {pipeline_mode = #tpu.pipeline_mode<synchronous>, transform_indices = @transform_1, window_bounds = array<i64: 32, 256>}, {pipeline_mode = #tpu.pipeline_mode<synchronous>, transform_indices = @transform_2, window_bounds = array<i64: 256, 256>}, {pipeline_mode = #tpu.pipeline_mode<synchronous>, transform_indices = @transform_3, window_bounds = array<i64: 256, 256>}, {pipeline_mode = #tpu.pipeline_mode<synchronous>, transform_indices = @transform_4, window_bounds = array<i64: 11, 256>}, {transform_indices = @transform_5, window_bounds = array<i64: 8, 1>}]} {
    %c0 = arith.constant 0 : index
    %c0_0 = arith.constant 0 : index
    %0 = vector.load %arg1[%c0, %c0_0] : memref<8x32xf32, #tpu.memory_space<vmem>>, vector<8x32xf32>
    %1 = arith.truncf %0 : vector<8x32xf32> to vector<8x32xbf16>
    %c0_1 = arith.constant 0 : index
    %c0_2 = arith.constant 0 : index
    %2 = vector.load %arg2[%c0_1, %c0_2] : memref<32x256xbf16, #tpu.memory_space<vmem>>, vector<32x256xbf16>
    %cst = arith.constant dense<0.000000e+00> : vector<8x256xf32>
    %3 = tpu.matmul %1, %2, %cst {dimension_numbers = #tpu.dot_dimension_numbers<[1], [0], [0], [1], [0, 0, 1, 1], [], []>} : vector<8x32xbf16>, vector<32x256xbf16>, vector<8x256xf32> -> vector<8x256xf32>
    %c0_3 = arith.constant 0 : index
    %c0_4 = arith.constant 0 : index
    %4 = vector.load %arg5[%c0_3, %c0_4] : memref<11x256xf32, #tpu.memory_space<vmem>>, vector<1x256xf32>
    %5 = vector.broadcast %4 : vector<1x256xf32> to vector<8x256xf32>
    %6 = arith.addf %3, %5 : vector<8x256xf32>
    %cst_5 = arith.constant dense<0.000000e+00> : vector<8xf32>
    %7 = vector.multi_reduction <add>, %6, %cst_5 [1] : vector<8x256xf32> to vector<8xf32>
    %8 = vector.shape_cast %7 : vector<8xf32> to vector<8x1xf32>
    %cst_6 = arith.constant 2.560000e+02 : f32
    %9 = vector.broadcast %cst_6 : f32 to vector<8x1xf32>
    %10 = arith.divf %8, %9 : vector<8x1xf32>
    %11 = vector.broadcast %10 : vector<8x1xf32> to vector<8x256xf32>
    %12 = arith.subf %6, %11 : vector<8x256xf32>
    %13 = arith.mulf %12, %12 : vector<8x256xf32>
    %cst_7 = arith.constant dense<0.000000e+00> : vector<8xf32>
    %14 = vector.multi_reduction <add>, %13, %cst_7 [1] : vector<8x256xf32> to vector<8xf32>
    %15 = vector.shape_cast %14 : vector<8xf32> to vector<8x1xf32>
    %cst_8 = arith.constant 2.560000e+02 : f32
    %16 = vector.broadcast %cst_8 : f32 to vector<8x1xf32>
    %17 = arith.divf %15, %16 : vector<8x1xf32>
    %cst_9 = arith.constant 9.99999974E-6 : f32
    %18 = vector.broadcast %cst_9 : f32 to vector<8x1xf32>
    %19 = arith.addf %17, %18 : vector<8x1xf32>
    %20 = math.rsqrt %19 : vector<8x1xf32>
    %21 = vector.broadcast %20 : vector<8x1xf32> to vector<8x256xf32>
    %22 = arith.mulf %12, %21 : vector<8x256xf32>
    %c1 = arith.constant 1 : index
    %c0_10 = arith.constant 0 : index
    %23 = vector.load %arg5[%c1, %c0_10] : memref<11x256xf32, #tpu.memory_space<vmem>>, vector<1x256xf32>
    %c2 = arith.constant 2 : index
    %c0_11 = arith.constant 0 : index
    %24 = vector.load %arg5[%c2, %c0_11] : memref<11x256xf32, #tpu.memory_space<vmem>>, vector<1x256xf32>
    %25 = vector.broadcast %23 : vector<1x256xf32> to vector<8x256xf32>
    %26 = arith.mulf %22, %25 : vector<8x256xf32>
    %27 = vector.broadcast %24 : vector<1x256xf32> to vector<8x256xf32>
    %28 = arith.addf %26, %27 : vector<8x256xf32>
    %cst_12 = arith.constant 0.000000e+00 : f32
    %29 = vector.broadcast %cst_12 : f32 to vector<8x256xf32>
    %30 = arith.maximumf %28, %29 : vector<8x256xf32>
    %31 = arith.truncf %30 : vector<8x256xf32> to vector<8x256xbf16>
    %c0_13 = arith.constant 0 : index
    %c0_14 = arith.constant 0 : index
    %32 = vector.load %arg3[%c0_13, %c0_14] : memref<256x256xbf16, #tpu.memory_space<vmem>>, vector<256x256xbf16>
    %cst_15 = arith.constant dense<0.000000e+00> : vector<8x256xf32>
    %33 = tpu.matmul %31, %32, %cst_15 {dimension_numbers = #tpu.dot_dimension_numbers<[1], [0], [0], [1], [0, 0, 1, 1], [], []>} : vector<8x256xbf16>, vector<256x256xbf16>, vector<8x256xf32> -> vector<8x256xf32>
    %c3 = arith.constant 3 : index
    %c0_16 = arith.constant 0 : index
    %34 = vector.load %arg5[%c3, %c0_16] : memref<11x256xf32, #tpu.memory_space<vmem>>, vector<1x256xf32>
    %35 = vector.broadcast %34 : vector<1x256xf32> to vector<8x256xf32>
    %36 = arith.addf %33, %35 : vector<8x256xf32>
    %cst_17 = arith.constant dense<0.000000e+00> : vector<8xf32>
    %37 = vector.multi_reduction <add>, %36, %cst_17 [1] : vector<8x256xf32> to vector<8xf32>
    %38 = vector.shape_cast %37 : vector<8xf32> to vector<8x1xf32>
    %cst_18 = arith.constant 2.560000e+02 : f32
    %39 = vector.broadcast %cst_18 : f32 to vector<8x1xf32>
    %40 = arith.divf %38, %39 : vector<8x1xf32>
    %41 = vector.broadcast %40 : vector<8x1xf32> to vector<8x256xf32>
    %42 = arith.subf %36, %41 : vector<8x256xf32>
    %43 = arith.mulf %42, %42 : vector<8x256xf32>
    %cst_19 = arith.constant dense<0.000000e+00> : vector<8xf32>
    %44 = vector.multi_reduction <add>, %43, %cst_19 [1] : vector<8x256xf32> to vector<8xf32>
    %45 = vector.shape_cast %44 : vector<8xf32> to vector<8x1xf32>
    %cst_20 = arith.constant 2.560000e+02 : f32
    %46 = vector.broadcast %cst_20 : f32 to vector<8x1xf32>
    %47 = arith.divf %45, %46 : vector<8x1xf32>
    %cst_21 = arith.constant 9.99999974E-6 : f32
    %48 = vector.broadcast %cst_21 : f32 to vector<8x1xf32>
    %49 = arith.addf %47, %48 : vector<8x1xf32>
    %50 = math.rsqrt %49 : vector<8x1xf32>
    %51 = vector.broadcast %50 : vector<8x1xf32> to vector<8x256xf32>
    %52 = arith.mulf %42, %51 : vector<8x256xf32>
    %c4 = arith.constant 4 : index
    %c0_22 = arith.constant 0 : index
    %53 = vector.load %arg5[%c4, %c0_22] : memref<11x256xf32, #tpu.memory_space<vmem>>, vector<1x256xf32>
    %c5 = arith.constant 5 : index
    %c0_23 = arith.constant 0 : index
    %54 = vector.load %arg5[%c5, %c0_23] : memref<11x256xf32, #tpu.memory_space<vmem>>, vector<1x256xf32>
    %55 = vector.broadcast %53 : vector<1x256xf32> to vector<8x256xf32>
    %56 = arith.mulf %52, %55 : vector<8x256xf32>
    %57 = vector.broadcast %54 : vector<1x256xf32> to vector<8x256xf32>
    %58 = arith.addf %56, %57 : vector<8x256xf32>
    %cst_24 = arith.constant 0.000000e+00 : f32
    %59 = vector.broadcast %cst_24 : f32 to vector<8x256xf32>
    %60 = arith.maximumf %58, %59 : vector<8x256xf32>
    %61 = arith.truncf %60 : vector<8x256xf32> to vector<8x256xbf16>
    %c0_25 = arith.constant 0 : index
    %c0_26 = arith.constant 0 : index
    %62 = vector.load %arg4[%c0_25, %c0_26] : memref<256x256xbf16, #tpu.memory_space<vmem>>, vector<256x256xbf16>
    %cst_27 = arith.constant dense<0.000000e+00> : vector<8x256xf32>
    %63 = tpu.matmul %61, %62, %cst_27 {dimension_numbers = #tpu.dot_dimension_numbers<[1], [0], [0], [1], [0, 0, 1, 1], [], []>} : vector<8x256xbf16>, vector<256x256xbf16>, vector<8x256xf32> -> vector<8x256xf32>
    %c6 = arith.constant 6 : index
    %c0_28 = arith.constant 0 : index
    %64 = vector.load %arg5[%c6, %c0_28] : memref<11x256xf32, #tpu.memory_space<vmem>>, vector<1x256xf32>
    %65 = vector.broadcast %64 : vector<1x256xf32> to vector<8x256xf32>
    %66 = arith.addf %63, %65 : vector<8x256xf32>
    %cst_29 = arith.constant dense<0.000000e+00> : vector<8xf32>
    %67 = vector.multi_reduction <add>, %66, %cst_29 [1] : vector<8x256xf32> to vector<8xf32>
    %68 = vector.shape_cast %67 : vector<8xf32> to vector<8x1xf32>
    %cst_30 = arith.constant 2.560000e+02 : f32
    %69 = vector.broadcast %cst_30 : f32 to vector<8x1xf32>
    %70 = arith.divf %68, %69 : vector<8x1xf32>
    %71 = vector.broadcast %70 : vector<8x1xf32> to vector<8x256xf32>
    %72 = arith.subf %66, %71 : vector<8x256xf32>
    %73 = arith.mulf %72, %72 : vector<8x256xf32>
    %cst_31 = arith.constant dense<0.000000e+00> : vector<8xf32>
    %74 = vector.multi_reduction <add>, %73, %cst_31 [1] : vector<8x256xf32> to vector<8xf32>
    %75 = vector.shape_cast %74 : vector<8xf32> to vector<8x1xf32>
    %cst_32 = arith.constant 2.560000e+02 : f32
    %76 = vector.broadcast %cst_32 : f32 to vector<8x1xf32>
    %77 = arith.divf %75, %76 : vector<8x1xf32>
    %cst_33 = arith.constant 9.99999974E-6 : f32
    %78 = vector.broadcast %cst_33 : f32 to vector<8x1xf32>
    %79 = arith.addf %77, %78 : vector<8x1xf32>
    %80 = math.rsqrt %79 : vector<8x1xf32>
    %81 = vector.broadcast %80 : vector<8x1xf32> to vector<8x256xf32>
    %82 = arith.mulf %72, %81 : vector<8x256xf32>
    %c7 = arith.constant 7 : index
    %c0_34 = arith.constant 0 : index
    %83 = vector.load %arg5[%c7, %c0_34] : memref<11x256xf32, #tpu.memory_space<vmem>>, vector<1x256xf32>
    %c8 = arith.constant 8 : index
    %c0_35 = arith.constant 0 : index
    %84 = vector.load %arg5[%c8, %c0_35] : memref<11x256xf32, #tpu.memory_space<vmem>>, vector<1x256xf32>
    %85 = vector.broadcast %83 : vector<1x256xf32> to vector<8x256xf32>
    %86 = arith.mulf %82, %85 : vector<8x256xf32>
    %87 = vector.broadcast %84 : vector<1x256xf32> to vector<8x256xf32>
    %88 = arith.addf %86, %87 : vector<8x256xf32>
    %cst_36 = arith.constant 0.000000e+00 : f32
    %89 = vector.broadcast %cst_36 : f32 to vector<8x256xf32>
    %90 = arith.maximumf %88, %89 : vector<8x256xf32>
    %c9 = arith.constant 9 : index
    %c0_37 = arith.constant 0 : index
    %91 = vector.load %arg5[%c9, %c0_37] : memref<11x256xf32, #tpu.memory_space<vmem>>, vector<1x256xf32>
    %c10 = arith.constant 10 : index
    %c0_38 = arith.constant 0 : index
    %92 = vector.load %arg5[%c10, %c0_38] : memref<11x256xf32, #tpu.memory_space<vmem>>, vector<1x1xf32>
    %93 = vector.broadcast %91 : vector<1x256xf32> to vector<8x256xf32>
    %94 = arith.mulf %90, %93 : vector<8x256xf32>
    %cst_39 = arith.constant dense<0.000000e+00> : vector<8xf32>
    %95 = vector.multi_reduction <add>, %94, %cst_39 [1] : vector<8x256xf32> to vector<8xf32>
    %96 = vector.shape_cast %95 : vector<8xf32> to vector<8x1xf32>
    %97 = vector.broadcast %92 : vector<1x1xf32> to vector<8x1xf32>
    %98 = arith.addf %96, %97 : vector<8x1xf32>
    %c0_40 = arith.constant 0 : index
    %c0_41 = arith.constant 0 : index
    %99 = vector.load %arg6[%c0_40, %c0_41] : memref<8x1xf32, #tpu.memory_space<vmem>>, vector<8x1xf32>
    tpu.vector_store %arg6[%c0_40, %c0_41], %98 {strides = array<i32>} : memref<8x1xf32, #tpu.memory_space<vmem>>, vector<8x1xf32>,
    return
  }
  func.func @transform_0(%arg0: i32) -> (i32, i32) {
    %c0_i32 = arith.constant 0 : i32
    %c0_i32_0 = arith.constant 0 : i32
    return %arg0, %c0_i32 : i32, i32
  }
  func.func @transform_1(%arg0: i32) -> (i32, i32) {
    %c0_i32 = arith.constant 0 : i32
    %c0_i32_0 = arith.constant 0 : i32
    %c0_i32_1 = arith.constant 0 : i32
    return %c0_i32, %c0_i32_0 : i32, i32
  }
  func.func @transform_2(%arg0: i32) -> (i32, i32) {
    %c0_i32 = arith.constant 0 : i32
    %c0_i32_0 = arith.constant 0 : i32
    %c0_i32_1 = arith.constant 0 : i32
    return %c0_i32, %c0_i32_0 : i32, i32
  }
  func.func @transform_3(%arg0: i32) -> (i32, i32) {
    %c0_i32 = arith.constant 0 : i32
    %c0_i32_0 = arith.constant 0 : i32
    %c0_i32_1 = arith.constant 0 : i32
    return %c0_i32, %c0_i32_0 : i32, i32
  }
  func.func @transform_4(%arg0: i32) -> (i32, i32) {
    %c0_i32 = arith.constant 0 : i32
    %c0_i32_0 = arith.constant 0 : i32
    %c0_i32_1 = arith.constant 0 : i32
    return %c0_i32, %c0_i32_0 : i32, i32
  }
  func.func @transform_5(%arg0: i32) -> (i32, i32) {
    %c0_i32 = arith.constant 0 : i32
    %c0_i32_0 = arith.constant 0 : i32
    return %arg0, %c0_i32 : i32, i32
  }
}

</mosaic_0001>

<bundles_post_ra>
// kernel: value_function_forward.1
= control target key start
LH: loop header
LB: loop body
LE: loop exit
PB: predicated region body
PF: predicated region fallthrough
CT: control target
= control target key end

     0   :  { %10 = vsyncpa [#allocation3], 0  ;;  %s1402_s0 = inlined_call_operand.hbm [shape: f32[8,32], index: 0, kind: input, shape index: {}]   ;;  %s1403_s1 = inlined_call_operand.hbm [shape: bf16[32,256], index: 1, kind: input, shape index: {}]   ;;  %s1404_s2 = inlined_call_operand.hbm [shape: bf16[256,256], index: 2, kind: input, shape index: {}]   ;;  %s1405_s3 = inlined_call_operand.hbm [shape: bf16[256,256], index: 3, kind: input, shape index: {}]   ;;  %s1406_s4 = inlined_call_operand.hbm [shape: f32[11,256], index: 4, kind: input, shape index: {}]   ;;  %s1407_s5 = inlined_call_operand.vmem [shape: f32[8,1], index: 5, kind: output, shape index: {}]  }
   0x1   :  { %11 = vsyncpa [#allocation5], 0  ;;  %s28_s20 = sshll.u32 %s1403_s1, 4  ;;  %s29_s20 = int_to_ptr.hbm [resolvable:$true] %s28_s20 }
   0x2   :  { %12 = vsyncpa [#allocation8], 0  ;;  %s1316_s21 = smov [#allocation4]   ;;  %s54_s25 = sshll.u32 %s1405_s3, 4  ;;  %s55_s25 = int_to_ptr.hbm [resolvable:$true] %s54_s25 }
   0x3   :  { %s30_s22 = sshll.u32 %s1316_s21, 4  ;;  %s1317_s26 = smov 128   ;;  %s31_s22 = int_to_ptr.vmem [resolvable:$true] %s30_s22 }
   0x4   :  { %s1318_s27 = smov 8   ;;  %s1319_s28 = smov [#allocation7]  }
   0x5   :  { %36 = dma.hbm_to_vmem [thread:$0]  %s29_s20, 512, %s31_s22, [#allocation5], %s1317_s26, %s1317_s26, %s1318_s27  }
   0x6   :  { %s56_s29 = sshll.u32 %s1319_s28, 4  ;;  %s18_s7 = sshll.u32 %s1402_s0, 4  ;;  %s57_s29 = int_to_ptr.vmem [resolvable:$true] %s56_s29  ;;  %s19_s7 = int_to_ptr.hbm [resolvable:$true] %s18_s7 }
   0x7   :  { %62 = dma.hbm_to_vmem [thread:$0]  %s55_s25, 4096, %s57_s29, [#allocation8], %s1317_s26, %s1317_s26, %s1318_s27  }
   0x8   :  { %s41_s9 = sshll.u32 %s1404_s2, 4  ;;  %s1320_s10 = smov [#allocation2]   ;;  %s42_s9 = int_to_ptr.hbm [resolvable:$true] %s41_s9 }
   0x9   :  { %s20_s11 = sshll.u32 %s1320_s10, 4  ;;  %s1321_s3 = smov [#allocation6]   ;;  %s21_s11 = int_to_ptr.vmem [resolvable:$true] %s20_s11 }
   0xa   :  { %23 = dma.hbm_to_vmem [thread:$0]  %s19_s7, 128, %s21_s11, [#allocation3]  }
   0xb   :  { %s43_s12 = sshll.u32 %s1321_s3, 4  ;;  %s67_s15 = sshll.u32 %s1406_s4, 4  ;;  %s44_s12 = int_to_ptr.vmem [resolvable:$true] %s43_s12  ;;  %s68_s15 = int_to_ptr.hbm [resolvable:$true] %s67_s15 }
   0xc   :  { %49 = dma.hbm_to_vmem [thread:$0]  %s42_s9, 4096, %s44_s12, [#allocation5], %s1317_s26, %s1317_s26, %s1318_s27  }
   0xd   :  { %s1322_s0 = smov [#allocation9]   ;;  %s1323_s17 = smov 256  }
   0xe   :  { %s69_s16 = sshll.u32 %s1322_s0, 4  ;;  %s1324_s18 = smov 16   ;;  %s70_s16 = int_to_ptr.vmem [resolvable:$true] %s69_s16 }
   0xf   :  { %75 = dma.hbm_to_vmem [thread:$0]  %s68_s15, 512, %s70_s16, [#allocation8], %s1323_s17, %s1323_s17, %s1324_s18  }
  0x10   :  { %1310 = dma.done.wait [#allocation3], 128  }
  0x11   :  { %1311 = vsyncadd [#allocation3], 4294967168 }
  0x12   :  { %1312 = dma.done.wait [#allocation5], 4608  }
  0x13   :  { %1313 = vsyncadd [#allocation5], 4294962688 }
  0x14   :  { %1314 = dma.done.wait [#allocation8], 4608  }
  0x15   :  { %1315 = vsyncadd [#allocation8], 4294962688  ;;  %v840_v0 = vld [vmem:[#allocation4 + $0x10] sm:$0xf]  ;;  %v1107_v1 = vld [vmem:[#allocation4 + $0x14] sm:$0xf0] }
  0x16   :  { %v1106_v2 = vld [vmem:[#allocation4 + $0x14] sm:$0xf]  ;;  %v841_v3 = vor.u32 %v1107_v1, %v840_v0  ;;  %v842_v4 = vld [vmem:[#allocation4 + $0x18] sm:$0xf0]  ;;  %v832_v5 = vld [vmem:[#allocation4] sm:$0xf] }
  0x17   :  { %v1105_v6 = vld [vmem:[#allocation4 + $0x4] sm:$0xf0]  ;;  %v845_v7 = vor.u32 %v1106_v2, %v842_v4  ;;  %v1104_v8 = vld [vmem:[#allocation4 + $0x4] sm:$0xf]  ;;  %v834_v9 = vld [vmem:[#allocation4 + $0x8] sm:$0xf0] }
  0x18   :  { %139 = vmatpush.bf16.msra.mxu0 %v841_v3  ;;  %v833_v10 = vor.u32 %v1105_v6, %v832_v5  ;;  %v97_v11 = vld [vmem:[#allocation2] sm:$0xff]  ;;  %v837_v12 = vor.u32 %v1104_v8, %v834_v9  ;;  %vm129_vm0 = vcmask 261120   ;;  %v103_v14 = vld [vmem:[#allocation9] ss:$8 sm:$0x3]  ;;  %v1325_v24 = vmov 256.0  }
  0x19   :  { %152 = vmatpush.bf16.msra.mxu1 %v845_v7  ;;  %v98_v13 = vpack.c.bf16 %v97_v11, %v97_v11  ;;  %v105_v15 = vperm.slane %v103_v14, 0  ;;  %v106_v16 = vperm.slane %v103_v14, 1  ;;  %1182 = vrcp.f32 %v1325_v24  ;;  %v906_v38 = vld [vmem:[#allocation6 + $0x70] sm:$0xf]  ;;  %v1123_v39 = vld [vmem:[#allocation6 + $0x74] sm:$0xf0] }
  0x1a   :  { %v970_v40 = vld [vmem:[#allocation6 + $0xf0] sm:$0xf]  ;;  %v907_v41 = vor.u32 %v1123_v39, %v906_v38  ;;  %v1139_v42 = vld [vmem:[#allocation6 + $0xf4] sm:$0xf0]  ;;  %v1122_v43 = vld [vmem:[#allocation6 + $0x74] sm:$0xf] }
  0x1b   :  { %v908_v44 = vld [vmem:[#allocation6 + $0x78] sm:$0xf0]  ;;  %v971_v45 = vor.u32 %v1139_v42, %v970_v40  ;;  %v1138_v47 = vld [vmem:[#allocation6 + $0xf4] sm:$0xf]  ;;  %v898_v50 = vld [vmem:[#allocation6 + $0x60] sm:$0xf] }
  0x1c   :  { %140 = vmatpush.bf16.msra.mxu0 %v833_v10  ;;  %v911_v46 = vor.u32 %v1122_v43, %v908_v44  ;;  %v972_v48 = vld [vmem:[#allocation6 + $0xf8] sm:$0xf0]  ;;  %412 = vmatpush.bf16.msra.mxu2 %v907_v41  ;;  %v1121_v51 = vld [vmem:[#allocation6 + $0x64] sm:$0xf0]  ;;  %v962_v52 = vld [vmem:[#allocation6 + $0xe0] sm:$0xf] }
  0x1d   :  { %153 = vmatpush.bf16.msra.mxu1 %v837_v12  ;;  %v975_v49 = vor.u32 %v1138_v47, %v972_v48  ;;  %425 = vmatpush.bf16.msra.mxu3 %v971_v45  ;;  %v899_v53 = vor.u32 %v1121_v51, %v898_v50  ;;  %v1137_v54 = vld [vmem:[#allocation6 + $0xe4] sm:$0xf0]  ;;  %v1120_v55 = vld [vmem:[#allocation6 + $0x64] sm:$0xf]  ;;  %v900_v56 = vld [vmem:[#allocation6 + $0x68] sm:$0xf0] }
  0x1e   :  { %v963_v57 = vor.u32 %v1137_v54, %v962_v52  ;;  %v903_v58 = vor.u32 %v1120_v55, %v900_v56  ;;  %v1136_v59 = vld [vmem:[#allocation6 + $0xe4] sm:$0xf]  ;;  %v964_v60 = vld [vmem:[#allocation6 + $0xe8] sm:$0xf0]  ;;  %v890_v62 = vld [vmem:[#allocation6 + $0x50] sm:$0xf] }
  0x1f   :  { %846 = vmatmul.msk.bf16.vlgmr.msra.gmra.mxu0 %vm129_vm0, %v98_v13  ;;  %v1183_v25 = vpop.eup %1182  ;;  %v967_v61 = vor.u32 %v1136_v59, %v964_v60  ;;  %v1119_v63 = vld [vmem:[#allocation6 + $0x54] sm:$0xf0]  ;;  %v954_v0 = vld [vmem:[#allocation6 + $0xd0] sm:$0xf]  ;;  %v1118_v3 = vld [vmem:[#allocation6 + $0x54] sm:$0xf] }
  0x20   :  { %847 = vmatmul.msk.bf16.vlgmr.msra.gmra.mxu1 %vm129_vm0, %v98_v13  ;;  %v163_v26 = vmul.f32 256.0, %v1183_v25  ;;  %vm167_vm1 = vweird.f32 %v1183_v25  ;;  %438 = vmatpush.bf16.msrb.mxu0 %v911_v46  ;;  %v891_v1 = vor.u32 %v1119_v63, %v890_v62  ;;  %v1135_v2 = vld [vmem:[#allocation6 + $0xd4] sm:$0xf0]  ;;  %v892_v4 = vld [vmem:[#allocation6 + $0x58] sm:$0xf0]  ;;  %vm821_vm11 = vcmask 7168  }
  0x21   :  { %451 = vmatpush.bf16.msrb.mxu1 %v975_v49  ;;  %413 = vmatpush.bf16.msra.mxu2 %v899_v53  ;;  %v955_v5 = vor.u32 %v1135_v2, %v954_v0  ;;  %v895_v6 = vor.u32 %v1118_v3, %v892_v4  ;;  %v1134_v7 = vld [vmem:[#allocation6 + $0xd4] sm:$0xf]  ;;  %v956_v8 = vld [vmem:[#allocation6 + $0xd8] sm:$0xf0]  ;;  %v882_v10 = vld [vmem:[#allocation6 + $0x40] sm:$0xf] }
  0x22   :  { %v164_v27 = vsub.f32 1.0, %v163_v26  ;;  %426 = vmatpush.bf16.msra.mxu3 %v963_v57  ;;  %v959_v9 = vor.u32 %v1134_v7, %v956_v8  ;;  %v1117_v11 = vld [vmem:[#allocation6 + $0x44] sm:$0xf0]  ;;  %v946_v12 = vld [vmem:[#allocation6 + $0xc0] sm:$0xf] }
  0x23   :  { %v883_v13 = vor.u32 %v1117_v11, %v882_v10  ;;  %v1133_v14 = vld [vmem:[#allocation6 + $0xc4] sm:$0xf0]  ;;  %v938_v24 = vld [vmem:[#allocation6 + $0xb0] sm:$0xf]  ;;  %v1131_v26 = vld [vmem:[#allocation6 + $0xb4] sm:$0xf0] }
  0x24   :  { %v165_v28 = vmul.f32 %v1183_v25, %v164_v27  ;;  %439 = vmatpush.bf16.msrb.mxu0 %v903_v58  ;;  %v1114_v27 = vld [vmem:[#allocation6 + $0x34] sm:$0xf]  ;;  %v1113_v38 = vld [vmem:[#allocation6 + $0x24] sm:$0xf0]  ;;  %v930_v39 = vld [vmem:[#allocation6 + $0xa0] sm:$0xf] }
  0x25   :  { %452 = vmatpush.bf16.msrb.mxu1 %v967_v61  ;;  %414 = vmatpush.bf16.msra.mxu2 %v891_v1  ;;  %v1129_v41 = vld [vmem:[#allocation6 + $0xa4] sm:$0xf0]  ;;  %v1112_v42 = vld [vmem:[#allocation6 + $0x24] sm:$0xf]  ;;  %v868_v43 = vld [vmem:[#allocation6 + $0x28] sm:$0xf0] }
  0x26   :  { %v166_v29 = vadd.f32 %v1183_v25, %v165_v28  ;;  %427 = vmatpush.bf16.msra.mxu3 %v955_v5  ;;  %v876_v28 = vld [vmem:[#allocation6 + $0x38] sm:$0xf0]  ;;  %v931_v44 = vor.u32 %v1129_v41, %v930_v39  ;;  %v871_v45 = vor.u32 %v1112_v42, %v868_v43  ;;  %v1128_v46 = vld [vmem:[#allocation6 + $0xa4] sm:$0xf]  ;;  %v932_v47 = vld [vmem:[#allocation6 + $0xa8] sm:$0xf0] }
  0x27   :  { %v858_v48 = vld [vmem:[#allocation6 + $0x10] sm:$0xf]  ;;  %v935_v49 = vor.u32 %v1128_v46, %v932_v47  ;;  %v1111_v50 = vld [vmem:[#allocation6 + $0x14] sm:$0xf0]  ;;  %v1110_v55 = vld [vmem:[#allocation6 + $0x14] sm:$0xf] }
  0x28   :  { %v1371_v30 = vsel %vm167_vm1, %v1183_v25, %v166_v29  ;;  %440 = vmatpush.bf16.msrb.mxu0 %v895_v6  ;;  %v939_v29 = vor.u32 %v1131_v26, %v938_v24  ;;  %v922_v51 = vld [vmem:[#allocation6 + $0x90] sm:$0xf]  ;;  %v1127_v52 = vld [vmem:[#allocation6 + $0x94] sm:$0xf0]  ;;  %v859_v53 = vor.u32 %v1111_v50, %v858_v48  ;;  %v860_v56 = vld [vmem:[#allocation6 + $0x18] sm:$0xf0] }
  0x29   :  { %453 = vmatpush.bf16.msrb.mxu1 %v959_v9  ;;  %415 = vmatpush.bf16.msra.mxu2 %v883_v13  ;;  %v923_v54 = vor.u32 %v1127_v52, %v922_v51  ;;  %v1126_v57 = vld [vmem:[#allocation6 + $0x94] sm:$0xf]  ;;  %v863_v58 = vor.u32 %v1110_v55, %v860_v56  ;;  %v924_v59 = vld [vmem:[#allocation6 + $0x98] sm:$0xf0]  ;;  %v850_v60 = vld [vmem:[#allocation6] sm:$0xf] }
  0x2a   :  { %v1109_v61 = vld [vmem:[#allocation6 + $0x4] sm:$0xf0]  ;;  %v927_v62 = vor.u32 %v1126_v57, %v924_v59  ;;  %v914_v63 = vld [vmem:[#allocation6 + $0x80] sm:$0xf]  ;;  %v1108_v1 = vld [vmem:[#allocation6 + $0x4] sm:$0xf] }
  0x2b   :  { %v1125_v0 = vld [vmem:[#allocation6 + $0x84] sm:$0xf0]  ;;  %v851_v2 = vor.u32 %v1109_v61, %v850_v60  ;;  %v852_v3 = vld [vmem:[#allocation6 + $0x8] sm:$0xf0]  ;;  %v1124_v4 = vld [vmem:[#allocation6 + $0x84] sm:$0xf] }
  0x2c   :  { %v916_v5 = vld [vmem:[#allocation6 + $0x88] sm:$0xf0]  ;;  %v915_v6 = vor.u32 %v1125_v0, %v914_v63  ;;  %v855_v7 = vor.u32 %v1108_v1, %v852_v3  ;;  %v1034_v59 = vld [vmem:[#allocation7 + $0x70] sm:$0xf]  ;;  %v1155_v60 = vld [vmem:[#allocation7 + $0x74] sm:$0xf0] }
  0x2d   :  { %v919_v8 = vor.u32 %v1124_v4, %v916_v5  ;;  %v1098_v61 = vld [vmem:[#allocation7 + $0xf0] sm:$0xf]  ;;  %v1171_v63 = vld [vmem:[#allocation7 + $0xf4] sm:$0xf0]  ;;  %v1154_v0 = vld [vmem:[#allocation7 + $0x74] sm:$0xf] }
  0x2e   :  { %v1036_v1 = vld [vmem:[#allocation7 + $0x78] sm:$0xf0]  ;;  %v1170_v4 = vld [vmem:[#allocation7 + $0xf4] sm:$0xf] }
  0x2f   :  { %v1039_v3 = vor.u32 %v1154_v0, %v1036_v1  ;;  %v1100_v5 = vld [vmem:[#allocation7 + $0xf8] sm:$0xf0]  ;;  %v996_v0 = vld [vmem:[#allocation7 + $0x28] sm:$0xf0] }
  0x9c   :  { %v142_v17 = vpop.f32.mrf.mxu0 }
  0x9d   :  { %v143_v18 = vadd.f32 %v142_v17, %v105_v15  ;;  %v155_v19 = vpop.f32.mrf.mxu1  ;;  %v1116_v15 = vld [vmem:[#allocation6 + $0x44] sm:$0xf]  ;;  %v947_v17 = vor.u32 %v1133_v14, %v946_v12 }
  0x9e   :  { %v156_v20 = vadd.f32 %v155_v19, %v106_v16  ;;  %v884_v16 = vld [vmem:[#allocation6 + $0x48] sm:$0xf0]  ;;  %v1132_v19 = vld [vmem:[#allocation6 + $0xc4] sm:$0xf] }
  0x9f   :  { %428 = vmatpush.bf16.msra.mxu3 %v947_v17  ;;  %v192_v17 = vld [vmem:[#allocation9 + $0x1] ss:$8 sm:$0x3] }
  0xa0   :  { %v159_v21 = vadd.f32 %v156_v20, %v143_v18 }
  0xa2   :  { %160 = vadd.xlane.f32.xlu0 %v159_v21 }
  0xa3   :  { %429 = vmatpush.bf16.msra.mxu3 %v939_v29 }
  0xa4   :  { %v144_v22 = vpop.f32.mrf.mxu0 }
  0xa5   :  { %v157_v23 = vpop.f32.mrf.mxu1  ;;  %v874_v22 = vld [vmem:[#allocation6 + $0x30] sm:$0xf] }
  0xa6   :  { %v1115_v23 = vld [vmem:[#allocation6 + $0x34] sm:$0xf0] }
  0xa7   :  { %v875_v25 = vor.u32 %v1115_v23, %v874_v22  ;;  %430 = vmatpush.bf16.msra.mxu3 %v931_v44 }
  0xa9   :  { %416 = vmatpush.bf16.msra.mxu2 %v875_v25 }
  0xab   :  { %431 = vmatpush.bf16.msra.mxu3 %v923_v54 }
  0xaf   :  { %432 = vmatpush.bf16.msra.mxu3 %v915_v6  ;;  %v1103_v6 = vor.u32 %v1170_v4, %v1100_v5  ;;  %v1060_v4 = vld [vmem:[#allocation7 + $0xa8] sm:$0xf0]  ;;  %v986_v5 = vld [vmem:[#allocation7 + $0x10] sm:$0xf] }
 0x115   :  { %v161_v31 = vpop.xlane.xlu0 %160 }
 0x116   :  { %v169_v32 = vmul.f32 %v1371_v30, %v161_v31  ;;  %v879_v31 = vor.u32 %v1114_v27, %v876_v28 }
 0x118   :  { %v1374_v33 = vsub.f32 %v143_v18, %v169_v32  ;;  %v1376_v34 = vsub.f32 %v156_v20, %v169_v32  ;;  %v887_v18 = vor.u32 %v1116_v15, %v884_v16  ;;  %v948_v20 = vld [vmem:[#allocation6 + $0xc8] sm:$0xf0]  ;;  %v1130_v32 = vld [vmem:[#allocation6 + $0xb4] sm:$0xf] }
 0x119   :  { %v951_v21 = vor.u32 %v1132_v19, %v948_v20  ;;  %v194_v19 = vld [vmem:[#allocation9 + $0x2] ss:$8 sm:$0x3]  ;;  %v196_v20 = vperm.slane %v192_v17, 0 }
 0x11a   :  { %v172_v35 = vmul.f32 %v1374_v33, %v1374_v33  ;;  %v173_v36 = vmul.f32 %v1376_v34, %v1376_v34  ;;  %441 = vmatpush.bf16.msrb.mxu0 %v887_v18  ;;  %v203_v24 = vperm.slane %v194_v19, 0  ;;  %v204_v26 = vperm.slane %v194_v19, 1  ;;  %v1018_v19 = vld [vmem:[#allocation7 + $0x50] sm:$0xf] }
 0x11b   :  { %454 = vmatpush.bf16.msrb.mxu1 %v951_v21  ;;  %v197_v21 = vperm.slane %v192_v17, 1  ;;  %v1092_v17 = vld [vmem:[#allocation7 + $0xe8] sm:$0xf0] }
 0x11c   :  { %v174_v37 = vadd.f32 %v173_v36, %v172_v35  ;;  %v940_v35 = vld [vmem:[#allocation6 + $0xb8] sm:$0xf0] }
 0x11d   :  { %v943_v36 = vor.u32 %v1130_v32, %v940_v35 }
 0x11e   :  { %175 = vadd.xlane.f32.xlu0 %v174_v37  ;;  %442 = vmatpush.bf16.msrb.mxu0 %v879_v31  ;;  %v866_v37 = vld [vmem:[#allocation6 + $0x20] sm:$0xf] }
 0x11f   :  { %455 = vmatpush.bf16.msrb.mxu1 %v943_v36  ;;  %v867_v40 = vor.u32 %v1113_v38, %v866_v37  ;;  %v246_v38 = vld [vmem:[#allocation9 + $0x3] ss:$8 sm:$0x3] }
 0x120   :  { %v249_v39 = vperm.slane %v246_v38, 1  ;;  %v248_v41 = vperm.slane %v246_v38, 0  ;;  %v1165_v38 = vld [vmem:[#allocation7 + $0xc4] sm:$0xf0] }
 0x121   :  { %417 = vmatpush.bf16.msra.mxu2 %v867_v40 }
 0x122   :  { %443 = vmatpush.bf16.msrb.mxu0 %v871_v45 }
 0x123   :  { %456 = vmatpush.bf16.msrb.mxu1 %v935_v49 }
 0x125   :  { %418 = vmatpush.bf16.msra.mxu2 %v859_v53 }
 0x126   :  { %444 = vmatpush.bf16.msrb.mxu0 %v863_v58 }
 0x127   :  { %457 = vmatpush.bf16.msrb.mxu1 %v927_v62  ;;  %v1035_v62 = vor.u32 %v1155_v60, %v1034_v59  ;;  %v1145_v59 = vld [vmem:[#allocation7 + $0x24] sm:$0xf0]  ;;  %v1058_v60 = vld [vmem:[#allocation7 + $0xa0] sm:$0xf] }
 0x129   :  { %419 = vmatpush.bf16.msra.mxu2 %v851_v2  ;;  %v1099_v2 = vor.u32 %v1171_v63, %v1098_v61  ;;  %v1144_v63 = vld [vmem:[#allocation7 + $0x24] sm:$0xf] }
 0x12a   :  { %445 = vmatpush.bf16.msrb.mxu0 %v855_v7  ;;  %v1026_v7 = vld [vmem:[#allocation7 + $0x60] sm:$0xf] }
 0x12b   :  { %458 = vmatpush.bf16.msrb.mxu1 %v919_v8  ;;  %723 = vmatpush.bf16.msrb.mxu3 %v1099_v2  ;;  %v1153_v8 = vld [vmem:[#allocation7 + $0x64] sm:$0xf0]  ;;  %v999_v2 = vor.u32 %v1144_v63, %v996_v0 }
 0x12d   :  { %710 = vmatpush.bf16.msrb.mxu2 %v1035_v62  ;;  %v1161_v62 = vld [vmem:[#allocation7 + $0xa4] sm:$0xf0] }
 0x12e   :  { %736 = vmatpush.bf16.msra.mxu0 %v1039_v3  ;;  %v1059_v1 = vor.u32 %v1161_v62, %v1058_v60  ;;  %v1160_v3 = vld [vmem:[#allocation7 + $0xa4] sm:$0xf] }
 0x12f   :  { %749 = vmatpush.bf16.msra.mxu1 %v1103_v6  ;;  %v1063_v6 = vor.u32 %v1160_v3, %v1060_v4 }
 0x191   :  { %v176_v9 = vpop.xlane.xlu0 %175 }
 0x192   :  { %v177_v10 = vmul.f32 %v176_v9, %v1371_v30  ;;  %v1090_v9 = vld [vmem:[#allocation7 + $0xe0] sm:$0xf] }
 0x194   :  { %v178_v11 = vadd.f32 1e-05, %v177_v10  ;;  %v1027_v10 = vor.u32 %v1153_v8, %v1026_v7  ;;  %v1143_v7 = vld [vmem:[#allocation7 + $0x14] sm:$0xf0]  ;;  %v1050_v8 = vld [vmem:[#allocation7 + $0x90] sm:$0xf] }
 0x196   :  { %1184 = vrsqrt.f32 %v178_v11  ;;  %vm185_vm3 = vweird.f32 %v178_v11  ;;  %711 = vmatpush.bf16.msrb.mxu2 %v1027_v10  ;;  %v987_v10 = vor.u32 %v1143_v7, %v986_v5 }
 0x19c   :  { %v1185_v12 = vpop.eup %1184 }
 0x19d   :  { %v180_v13 = vmul.f32 %v1185_v12, %v178_v11  ;;  %vm186_vm2 = vweird.f32 %v1185_v12  ;;  %v1169_v11 = vld [vmem:[#allocation7 + $0xe4] sm:$0xf0] }
 0x19e   :  { %vm187_vm4 = vmor %vm185_vm3, %vm186_vm2 }
 0x19f   :  { %v181_v14 = vmul.f32 %v1185_v12, %v180_v13  ;;  %v1028_v13 = vld [vmem:[#allocation7 + $0x68] sm:$0xf0] }
 0x1a1   :  { %v182_v15 = vmul.f32 0.5, %v181_v14  ;;  %v1091_v14 = vor.u32 %v1169_v11, %v1090_v9  ;;  %v1159_v9 = vld [vmem:[#allocation7 + $0x94] sm:$0xf0] }
 0x1a2   :  { %v1051_v11 = vor.u32 %v1159_v9, %v1050_v8 }
 0x1a3   :  { %v183_v16 = vsub.f32 1.5, %v182_v15  ;;  %724 = vmatpush.bf16.msrb.mxu3 %v1091_v14  ;;  %v1158_v14 = vld [vmem:[#allocation7 + $0x94] sm:$0xf] }
 0x1a5   :  { %v184_v18 = vmul.f32 %v1185_v12, %v183_v16  ;;  %v1168_v16 = vld [vmem:[#allocation7 + $0xe4] sm:$0xf] }
 0x1a7   :  { %v188_v22 = vsel %vm187_vm4, %v1185_v12, %v184_v18  ;;  %v1152_v12 = vld [vmem:[#allocation7 + $0x64] sm:$0xf]  ;;  %v1095_v18 = vor.u32 %v1168_v16, %v1092_v17  ;;  %v1052_v16 = vld [vmem:[#allocation7 + $0x98] sm:$0xf0]  ;;  %v978_v17 = vld [vmem:[#allocation7] sm:$0xf] }
 0x1a8   :  { %v189_v23 = vmul.f32 %v188_v22, %v1374_v33  ;;  %v190_v25 = vmul.f32 %v188_v22, %v1376_v34  ;;  %v1031_v15 = vor.u32 %v1152_v12, %v1028_v13  ;;  %v1142_v12 = vld [vmem:[#allocation7 + $0x14] sm:$0xf]  ;;  %v988_v13 = vld [vmem:[#allocation7 + $0x18] sm:$0xf0] }
 0x1a9   :  { %750 = vmatpush.bf16.msra.mxu1 %v1095_v18  ;;  %v1141_v18 = vld [vmem:[#allocation7 + $0x4] sm:$0xf0] }
 0x1aa   :  { %v200_v27 = vmul.f32 %v196_v20, %v189_v23  ;;  %v201_v28 = vmul.f32 %v197_v21, %v190_v25  ;;  %737 = vmatpush.bf16.msra.mxu0 %v1031_v15  ;;  %v1151_v20 = vld [vmem:[#allocation7 + $0x54] sm:$0xf0]  ;;  %v1082_v21 = vld [vmem:[#allocation7 + $0xd0] sm:$0xf]  ;;  %v1020_v25 = vld [vmem:[#allocation7 + $0x58] sm:$0xf0]  ;;  %v991_v15 = vor.u32 %v1142_v12, %v988_v13 }
 0x1ab   :  { %v1019_v22 = vor.u32 %v1151_v20, %v1018_v19  ;;  %v1167_v23 = vld [vmem:[#allocation7 + $0xd4] sm:$0xf0]  ;;  %v1055_v19 = vor.u32 %v1158_v14, %v1052_v16  ;;  %v1042_v20 = vld [vmem:[#allocation7 + $0x80] sm:$0xf] }
 0x1ac   :  { %v207_v29 = vadd.f32 %v203_v24, %v200_v27  ;;  %v208_v31 = vadd.f32 %v204_v26, %v201_v28  ;;  %v1150_v24 = vld [vmem:[#allocation7 + $0x54] sm:$0xf]  ;;  %v1083_v26 = vor.u32 %v1167_v23, %v1082_v21  ;;  %v1157_v21 = vld [vmem:[#allocation7 + $0x84] sm:$0xf0]  ;;  %v979_v23 = vor.u32 %v1141_v18, %v978_v17 }
 0x1ad   :  { %v1023_v27 = vor.u32 %v1150_v24, %v1020_v25  ;;  %v1166_v28 = vld [vmem:[#allocation7 + $0xd4] sm:$0xf]  ;;  %712 = vmatpush.bf16.msrb.mxu2 %v1019_v22  ;;  %v1140_v22 = vld [vmem:[#allocation7 + $0x4] sm:$0xf]  ;;  %v980_v24 = vld [vmem:[#allocation7 + $0x8] sm:$0xf0] }
 0x1ae   :  { %v209_v32 = vmax.f32 %v207_v29, 0.0  ;;  %v210_v35 = vmax.f32 %v208_v31, 0.0  ;;  %v1084_v29 = vld [vmem:[#allocation7 + $0xd8] sm:$0xf0]  ;;  %725 = vmatpush.bf16.msrb.mxu3 %v1083_v26  ;;  %v1156_v25 = vld [vmem:[#allocation7 + $0x84] sm:$0xf] }
 0x1af   :  { %v1087_v31 = vor.u32 %v1166_v28, %v1084_v29  ;;  %738 = vmatpush.bf16.msra.mxu0 %v1023_v27  ;;  %v1044_v26 = vld [vmem:[#allocation7 + $0x88] sm:$0xf0]  ;;  %v1043_v27 = vor.u32 %v1157_v21, %v1042_v20  ;;  %v983_v28 = vor.u32 %v1140_v22, %v980_v24 }
 0x1b0   :  { %v211_v36 = vpack.c.bf16 %v209_v32, %v209_v32  ;;  %v212_v37 = vpack.c.bf16 %v210_v35, %v210_v35  ;;  %v1010_v32 = vld [vmem:[#allocation7 + $0x40] sm:$0xf]  ;;  %v1149_v35 = vld [vmem:[#allocation7 + $0x44] sm:$0xf0]  ;;  %v1047_v29 = vor.u32 %v1156_v25, %v1044_v26 }
 0x1b1   :  { %751 = vmatpush.bf16.msra.mxu1 %v1087_v31  ;;  %v788_v24 = vld [vmem:[#allocation9 + $0x7] ss:$8 sm:$0x3]  ;;  %v790_v26 = vld [vmem:[#allocation9 + $0x10] ss:$8 sm:$0x3] }
 0x1b2   :  { %420 = vmatmul.bf16.vlgmr.msra.gmra.mxu2 %v211_v36  ;;  %433 = vmatmul.bf16.vlgmr.msra.gmra.mxu3 %v212_v37 }
 0x1b3   :  { %446 = vmatmul.bf16.vlgmr.msrb.gmra.mxu0 %v211_v36  ;;  %459 = vmatmul.bf16.vlgmr.msrb.gmra.mxu1 %v212_v37  ;;  %v1074_v36 = vld [vmem:[#allocation7 + $0xc0] sm:$0xf]  ;;  %v1011_v37 = vor.u32 %v1149_v35, %v1010_v32 }
 0x1b5   :  { %713 = vmatpush.bf16.msrb.mxu2 %v1011_v37 }
 0x230   :  { %v447_v40 = vpop.f32.mrf.mxu0  ;;  %v460_v33 = vpop.f32.mrf.mxu1 }
 0x231   :  { %v448_v42 = vadd.f32 %v447_v40, %v249_v39  ;;  %v1148_v39 = vld [vmem:[#allocation7 + $0x44] sm:$0xf]  ;;  %v1012_v40 = vld [vmem:[#allocation7 + $0x48] sm:$0xf0] }
 0x233   :  { %v461_v45 = vadd.f32 %v460_v33, %v448_v42  ;;  %v1075_v33 = vor.u32 %v1165_v38, %v1074_v36  ;;  %v1164_v42 = vld [vmem:[#allocation7 + $0xc4] sm:$0xf] }
 0x235   :  { %v421_v34 = vpop.f32.mrf.mxu2  ;;  %v434_v43 = vpop.f32.mrf.mxu3  ;;  %726 = vmatpush.bf16.msrb.mxu3 %v1075_v33  ;;  %v490_v33 = vld [vmem:[#allocation9 + $0x4] ss:$8 sm:$0x3] }
 0x236   :  { %v422_v44 = vadd.f32 %v421_v34, %v248_v41  ;;  %v1015_v41 = vor.u32 %v1148_v39, %v1012_v40  ;;  %v1076_v34 = vld [vmem:[#allocation7 + $0xc8] sm:$0xf0] }
 0x238   :  { %v435_v46 = vadd.f32 %v434_v43, %v422_v44  ;;  %v449_v47 = vpop.f32.mrf.mxu0  ;;  %v462_v48 = vpop.f32.mrf.mxu1  ;;  %v1079_v43 = vor.u32 %v1164_v42, %v1076_v34  ;;  %739 = vmatpush.bf16.msra.mxu0 %v1015_v41  ;;  %v1002_v44 = vld [vmem:[#allocation7 + $0x30] sm:$0xf]  ;;  %v492_v42 = vld [vmem:[#allocation9 + $0x5] ss:$8 sm:$0x3]  ;;  %v494_v34 = vperm.slane %v490_v33, 0 }
 0x239   :  { %v1163_v48 = vld [vmem:[#allocation7 + $0xb4] sm:$0xf0] }
 0x23a   :  { %v464_v49 = vadd.f32 %v461_v45, %v435_v46  ;;  %752 = vmatpush.bf16.msra.mxu1 %v1079_v43  ;;  %v495_v43 = vperm.slane %v490_v33, 1 }
 0x23c   :  { %465 = vadd.xlane.f32.xlu1 %v464_v49  ;;  %v1146_v49 = vld [vmem:[#allocation7 + $0x34] sm:$0xf] }
 0x23d   :  { %v423_v50 = vpop.f32.mrf.mxu2  ;;  %v436_v51 = vpop.f32.mrf.mxu3 }
 0x23e   :  { %v1004_v50 = vld [vmem:[#allocation7 + $0x38] sm:$0xf0] }
 0x2af   :  { %v466_v52 = vpop.xlane.xlu1 %465 }
 0x2b0   :  { %v467_v53 = vmul.f32 %v466_v52, %v1371_v30  ;;  %v1007_v52 = vor.u32 %v1146_v49, %v1004_v50 }
 0x2b2   :  { %v1386_v54 = vsub.f32 %v435_v46, %v467_v53  ;;  %v1388_v55 = vsub.f32 %v461_v45, %v467_v53  ;;  %v1147_v45 = vld [vmem:[#allocation7 + $0x34] sm:$0xf0]  ;;  %v1066_v46 = vld [vmem:[#allocation7 + $0xb0] sm:$0xf]  ;;  %v1162_v53 = vld [vmem:[#allocation7 + $0xb4] sm:$0xf]  ;;  %740 = vmatpush.bf16.msra.mxu0 %v1007_v52 }
 0x2b3   :  { %v1003_v47 = vor.u32 %v1147_v45, %v1002_v44  ;;  %v1067_v51 = vor.u32 %v1163_v48, %v1066_v46  ;;  %v501_v46 = vperm.slane %v492_v42, 0  ;;  %v502_v48 = vperm.slane %v492_v42, 1 }
 0x2b4   :  { %v470_v56 = vmul.f32 %v1386_v54, %v1386_v54  ;;  %v471_v57 = vmul.f32 %v1388_v55, %v1388_v55 }
 0x2b5   :  { %714 = vmatpush.bf16.msrb.mxu2 %v1003_v47  ;;  %727 = vmatpush.bf16.msrb.mxu3 %v1067_v51 }
 0x2b6   :  { %v472_v58 = vadd.f32 %v471_v57, %v470_v56  ;;  %v1068_v56 = vld [vmem:[#allocation7 + $0xb8] sm:$0xf0]  ;;  %741 = vmatpush.bf16.msra.mxu0 %v999_v2 }
 0x2b7   :  { %v1071_v57 = vor.u32 %v1162_v53, %v1068_v56 }
 0x2b8   :  { %473 = vadd.xlane.f32.xlu1 %v472_v58  ;;  %v994_v58 = vld [vmem:[#allocation7 + $0x20] sm:$0xf] }
 0x2b9   :  { %753 = vmatpush.bf16.msra.mxu1 %v1071_v57  ;;  %v995_v61 = vor.u32 %v1145_v59, %v994_v58  ;;  %728 = vmatpush.bf16.msrb.mxu3 %v1059_v1  ;;  %v544_v59 = vld [vmem:[#allocation9 + $0x6] ss:$8 sm:$0x3] }
 0x2ba   :  { %742 = vmatpush.bf16.msra.mxu0 %v991_v15  ;;  %v547_v60 = vperm.slane %v544_v59, 1  ;;  %v546_v62 = vperm.slane %v544_v59, 0 }
 0x2bb   :  { %715 = vmatpush.bf16.msrb.mxu2 %v995_v61 }
 0x2bd   :  { %754 = vmatpush.bf16.msra.mxu1 %v1063_v6  ;;  %729 = vmatpush.bf16.msrb.mxu3 %v1051_v11 }
 0x2be   :  { %743 = vmatpush.bf16.msra.mxu0 %v983_v28  ;;  %v793_v28 = vperm.slane %v788_v24, 1 }
 0x2bf   :  { %716 = vmatpush.bf16.msrb.mxu2 %v987_v10 }
 0x2c1   :  { %755 = vmatpush.bf16.msra.mxu1 %v1055_v19  ;;  %730 = vmatpush.bf16.msrb.mxu3 %v1043_v27  ;;  %v792_v27 = vperm.slane %v788_v24, 0 }
 0x2c3   :  { %717 = vmatpush.bf16.msrb.mxu2 %v979_v23 }
 0x2c5   :  { %756 = vmatpush.bf16.msra.mxu1 %v1047_v29 }
 0x32b   :  { %v474_v31 = vpop.xlane.xlu1 %473 }
 0x32c   :  { %v475_v32 = vmul.f32 %v474_v31, %v1371_v30 }
 0x32e   :  { %v476_v35 = vadd.f32 1e-05, %v475_v32 }
 0x330   :  { %1186 = vrsqrt.f32 %v476_v35  ;;  %vm483_vm6 = vweird.f32 %v476_v35 }
 0x336   :  { %v1187_v36 = vpop.eup %1186 }
 0x337   :  { %v478_v37 = vmul.f32 %v1187_v36, %v476_v35  ;;  %vm484_vm5 = vweird.f32 %v1187_v36  ;;  %v799_v35 = vperm.slane %v790_v26, 0 }
 0x338   :  { %vm485_vm7 = vmor %vm483_vm6, %vm484_vm5 }
 0x339   :  { %v479_v38 = vmul.f32 %v1187_v36, %v478_v37 }
 0x33b   :  { %v480_v39 = vmul.f32 0.5, %v479_v38 }
 0x33d   :  { %v481_v40 = vsub.f32 1.5, %v480_v39 }
 0x33f   :  { %v482_v41 = vmul.f32 %v1187_v36, %v481_v40 }
 0x341   :  { %v486_v44 = vsel %vm485_vm7, %v1187_v36, %v482_v41  ;;  %v808_v36 = vld [vmem:[#allocation9 + $0x11] ss:$8 sm:$0x3] }
 0x342   :  { %v487_v45 = vmul.f32 %v486_v44, %v1386_v54  ;;  %v488_v47 = vmul.f32 %v486_v44, %v1388_v55  ;;  %v811_v33 = vperm.slane %v808_v36, 0  ;;  %v812_v41 = vperm.slane %v808_v36, 1 }
 0x344   :  { %v498_v49 = vmul.f32 %v494_v34, %v487_v45  ;;  %v499_v50 = vmul.f32 %v495_v43, %v488_v47 }
 0x346   :  { %v505_v51 = vadd.f32 %v501_v46, %v498_v49  ;;  %v506_v52 = vadd.f32 %v502_v48, %v499_v50  ;;  %v809_v46 = vld [vmem:[#allocation9 + $0x12] ss:$0 sm:$0xff] }
 0x348   :  { %v507_v53 = vmax.f32 %v505_v51, 0.0  ;;  %v508_v56 = vmax.f32 %v506_v52, 0.0 }
 0x34a   :  { %v509_v57 = vpack.c.bf16 %v507_v53, %v507_v53  ;;  %v510_v58 = vpack.c.bf16 %v508_v56, %v508_v56 }
 0x34c   :  { %718 = vmatmul.bf16.vlgmr.msrb.gmra.mxu2 %v509_v57  ;;  %731 = vmatmul.bf16.vlgmr.msrb.gmra.mxu3 %v510_v58 }
 0x34d   :  { %744 = vmatmul.bf16.vlgmr.msra.gmra.mxu0 %v509_v57  ;;  %757 = vmatmul.bf16.vlgmr.msra.gmra.mxu1 %v510_v58 }
 0x3ca   :  { %v745_v61 = vpop.f32.mrf.mxu0  ;;  %v758_v54 = vpop.f32.mrf.mxu1 }
 0x3cb   :  { %v746_v63 = vadd.f32 %v745_v61, %v547_v60 }
 0x3cd   :  { %v759_v2 = vadd.f32 %v758_v54, %v746_v63 }
 0x3cf   :  { %v719_v55 = vpop.f32.mrf.mxu2  ;;  %v732_v0 = vpop.f32.mrf.mxu3 }
 0x3d0   :  { %v720_v1 = vadd.f32 %v719_v55, %v546_v62 }
 0x3d2   :  { %v733_v3 = vadd.f32 %v732_v0, %v720_v1  ;;  %v747_v4 = vpop.f32.mrf.mxu0  ;;  %v760_v5 = vpop.f32.mrf.mxu1 }
 0x3d4   :  { %v762_v6 = vadd.f32 %v759_v2, %v733_v3 }
 0x3d6   :  { %763 = vadd.xlane.f32.xlu2 %v762_v6 }
 0x3d7   :  { %v721_v7 = vpop.f32.mrf.mxu2  ;;  %v734_v8 = vpop.f32.mrf.mxu3 }
 0x449   :  { %v764_v9 = vpop.xlane.xlu2 %763 }
 0x44a   :  { %v765_v10 = vmul.f32 %v764_v9, %v1371_v30 }
 0x44c   :  { %v766_v11 = vsub.f32 %v733_v3, %v765_v10  ;;  %v767_v12 = vsub.f32 %v759_v2, %v765_v10 }
 0x44e   :  { %v768_v13 = vmul.f32 %v766_v11, %v766_v11  ;;  %v769_v14 = vmul.f32 %v767_v12, %v767_v12 }
 0x450   :  { %v770_v15 = vadd.f32 %v769_v14, %v768_v13 }
 0x452   :  { %771 = vadd.xlane.f32.xlu2 %v770_v15 }
 0x4c5   :  { %v772_v16 = vpop.xlane.xlu2 %771 }
 0x4c6   :  { %v773_v17 = vmul.f32 %v772_v16, %v1371_v30  ;;  %v800_v30 = vperm.slane %v790_v26, 1 }
 0x4c8   :  { %v774_v18 = vadd.f32 1e-05, %v773_v17 }
 0x4ca   :  { %1188 = vrsqrt.f32 %v774_v18  ;;  %vm781_vm9 = vweird.f32 %v774_v18 }
 0x4d0   :  { %v1189_v19 = vpop.eup %1188 }
 0x4d1   :  { %v776_v20 = vmul.f32 %v1189_v19, %v774_v18  ;;  %vm782_vm8 = vweird.f32 %v1189_v19 }
 0x4d2   :  { %vm783_vm10 = vmor %vm781_vm9, %vm782_vm8 }
 0x4d3   :  { %v777_v21 = vmul.f32 %v1189_v19, %v776_v20 }
 0x4d5   :  { %v778_v22 = vmul.f32 0.5, %v777_v21 }
 0x4d7   :  { %v779_v23 = vsub.f32 1.5, %v778_v22 }
 0x4d9   :  { %v780_v25 = vmul.f32 %v1189_v19, %v779_v23 }
 0x4db   :  { %v784_v29 = vsel %vm783_vm10, %v1189_v19, %v780_v25 }
 0x4dc   :  { %v785_v31 = vmul.f32 %v784_v29, %v766_v11  ;;  %v786_v32 = vmul.f32 %v784_v29, %v767_v12 }
 0x4de   :  { %v796_v37 = vmul.f32 %v792_v27, %v785_v31  ;;  %v797_v38 = vmul.f32 %v793_v28, %v786_v32 }
 0x4e0   :  { %v803_v39 = vadd.f32 %v799_v35, %v796_v37  ;;  %v804_v40 = vadd.f32 %v800_v30, %v797_v38 }
 0x4e2   :  { %v805_v42 = vmax.f32 %v803_v39, 0.0  ;;  %v806_v34 = vmax.f32 %v804_v40, 0.0 }
 0x4e4   :  { %v815_v43 = vmul.f32 %v811_v33, %v805_v42  ;;  %v816_v44 = vmul.f32 %v812_v41, %v806_v34 }
 0x4e6   :  { %v817_v45 = vadd.f32 %v816_v44, %v815_v43 }
 0x4e8   :  { %818 = vadd.xlane.f32.xlu0 %v817_v45 }
 0x55b   :  { %v819_v47 = vpop.xlane.xlu0 %818 }
 0x55c   :  { %v820_v48 = vadd.f32 %v819_v47, %v809_v46 }
 0x55e   :  { %822 = vst.msk [vmem:[%s1407_s5] sm:$0xff] %vm821_vm11, %v820_v48 }
 0x55f   :  { %827 = vsyncpa [#allocation3], 1 }
 0x560   :  { %828 = vsyncpa [#allocation5], 1 }
 0x561   :  { %829 = vsyncpa [#allocation8], 1 }

</bundles_post_ra>
